<compile_context>
chip_gen: v5e
topology: v5e:2x2
jax: 0.10.0
libtpu: 0.0.40
codegen_flags: <defaults>
</compile_context>

<pallas_src>
import functools

import jax
import jax.numpy as jnp
from jax.experimental import pallas as pl
from jax.experimental.pallas import tpu as pltpu

_NEG_PAD = -1e30  # bias padding value: ~0 contribution to sum-exp, never the max (f32 only).


def _round_up(x, m):
    return (x + m - 1) // m * m


def _cdiv(a, b):
    return (a + b - 1) // b


def _is_multi_core_chip():
    # v7x has 2 TensorCores per chip; v5e/v6e have 1.
    try:
        kind = jax.devices()[0].device_kind.lower()
    except Exception:
        return False
    return "v7" in kind


def _generator_kernel(x_ref, w_ref, b_ref, o_ref, m_ref, s_ref, *,
                      tv, v_total, mask_v_tail):
    p = pl.program_id(1)   # 0: online max/sum-exp sweep, 1: write sweep
    j = pl.program_id(2)   # vocab-tile index

    # MXU matmul with f32 accumulation; bias add + softmax math stay in f32.
    logits = jnp.dot(x_ref[...], w_ref[...], preferred_element_type=jnp.float32)
    logits = logits + b_ref[pl.ds(j, 1), :]   # resident bias, one (1, tv) row per V tile

    if mask_v_tail:
        # Mask vocab columns past V (ragged last tile reads garbage weight columns).
        col = jax.lax.broadcasted_iota(jnp.int32, (1, tv), 1) + j * tv
        logits = jnp.where(col < v_total, logits, -jnp.inf)

    @pl.when((p == 0) & (j == 0))
    def _():
        m_ref[...] = jnp.full(m_ref.shape, -jnp.inf, m_ref.dtype)
        s_ref[...] = jnp.zeros(s_ref.shape, s_ref.dtype)

    @pl.when(p == 0)
    def _():
        m_prev = m_ref[...]
        m_new = jnp.maximum(m_prev, jnp.max(logits, axis=-1, keepdims=True))
        # Rescale the running sum-exp accumulator when the running max moves.
        s_ref[...] = s_ref[...] * jnp.exp(m_prev - m_new) + jnp.sum(
            jnp.exp(logits - m_new), axis=-1, keepdims=True)
        m_ref[...] = m_new

    @pl.when((p == 1) & (j == 0))
    def _():
        # Collapse (max, sum-exp) into the log-sum-exp once per M tile and reuse it for all
        # V tiles of the write pass (saves n_v redundant EUP log calls per M tile).
        m_ref[...] = m_ref[...] + jnp.log(s_ref[...])

    @pl.when(p == 1)
    def _():
        o_ref[...] = (logits - m_ref[...]).astype(o_ref.dtype)


def generator_forward(x, w, b, *, tm=512, tv=1024,
                      compute_dtype=jnp.bfloat16, out_dtype=None):
    """x: [..., D]; w: [D, V]; b: [V]  ->  log_softmax(x @ w + b, axis=-1) : [..., V]"""
    *lead, D = x.shape
    V = w.shape[-1]
    M = 1
    for d in lead:
        M *= d

    if out_dtype is None:
        out_dtype = x.dtype

    x2 = x.reshape(M, D)
    w2 = w
    if compute_dtype is not None:
        x2 = x2.astype(compute_dtype)
        w2 = w2.astype(compute_dtype)
    b32 = b.astype(jnp.float32)

    # ---- Tile selection ------------------------------------------------------------------
    tm = max(16, min(int(tm), _round_up(M, 16)))      # multiple of 16 (f32 & bf16 sublane)
    tv = max(128, min(int(tv), _round_up(V, 128)))    # multiple of 128 (lane dim)

    # Keep both TensorCores busy on v7x: make the "parallel" M axis have >= 2 tiles.
    # (Single-TC chips skip this - splitting would only double the weight re-streaming.)
    if _is_multi_core_chip() and M >= 32 and _cdiv(M, tm) < 2:
        tm = max(16, _round_up(_cdiv(M, 2), 16))

    # ---- Per-generation VMEM budget --------------------------------------------------------
    try:
        vmem_cap = int(pltpu.get_tpu_info().vmem_capacity_bytes)
    except Exception:
        vmem_cap = 64 << 20                 # conservative fallback (v7x per-TC capacity)
    budget = (vmem_cap * 3) // 4            # headroom for compiler-internal scratch

    xb = jnp.dtype(x2.dtype).itemsize
    wb = jnp.dtype(w2.dtype).itemsize
    ob = jnp.dtype(out_dtype).itemsize

    def _pad_bytes(r, c, itemsize):
        sub = {4: 8, 2: 16, 1: 32}.get(itemsize, 8)
        return _round_up(r, sub) * _round_up(max(c, 1), 128) * itemsize

    def _vmem_needed(tm_, tv_):
        n_v_ = _cdiv(V, tv_)
        return (2 * _pad_bytes(tm_, D, xb)         # x tile, double buffered
                + 2 * _pad_bytes(D, tv_, wb)       # weight tile, double buffered
                + 2 * _pad_bytes(tm_, tv_, ob)     # output tile, double buffered
                + 2 * _pad_bytes(n_v_, tv_, 4)     # resident bias (counted 2x, conservative)
                + 2 * 2 * _pad_bytes(tm_, 1, 4))   # two (tm,1) f32 scratches (lane-pad 128)

    # Shrink the vocab tile first, then the row tile, if the double buffers would not fit.
    while _vmem_needed(tm, tv) * 5 // 4 + (4 << 20) > budget and tv > 128:
        tv = max(128, _round_up(tv // 2, 128))
    while _vmem_needed(tm, tv) * 5 // 4 + (4 << 20) > budget and tm > 64:
        tm = max(64, _round_up(tm // 2, 16))

    vmem_limit = int(min(max(_vmem_needed(tm, tv) * 5 // 4 + (4 << 20), 32 << 20), budget))

    n_m = _cdiv(M, tm)
    n_v = _cdiv(V, tv)

    # Bias: pad (tiny, <= tv*4 bytes) to whole tiles, keep resident in VMEM for the whole
    # kernel -> one DMA instead of 2*n_m*n_v tiny per-step DMAs.  Padded columns are also
    # masked in-kernel, the _NEG_PAD value is just belt-and-braces.
    V_b = n_v * tv
    if V_b != V:
        b32 = jnp.pad(b32, (0, V_b - V), constant_values=_NEG_PAD)
    b2 = b32.reshape(n_v, tv)

    kernel = functools.partial(_generator_kernel, tv=tv, v_total=V,
                               mask_v_tail=(V % tv != 0))

    out = pl.pallas_call(
        kernel,
        out_shape=jax.ShapeDtypeStruct((M, V), out_dtype),
        grid_spec=pltpu.PrefetchScalarGridSpec(
            num_scalar_prefetch=0,
            grid=(n_m, 2, n_v),
            in_specs=[
                pl.BlockSpec((tm, D), lambda i, p, j: (i, 0)),    # x tile (reused over p, j)
                pl.BlockSpec((D, tv), lambda i, p, j: (0, j)),    # weight vocab tile (streamed)
                pl.BlockSpec((n_v, tv), lambda i, p, j: (0, 0)),  # whole bias, resident
            ],
            # During pass 0 every step maps to block (i, 0) and nothing is written; the block
            # is only stored after pass 1 fills it -> exactly one M*V writeback.
            out_specs=pl.BlockSpec((tm, tv), lambda i, p, j: (i, p * j)),
            scratch_shapes=[
                pltpu.VMEM((tm, 1), jnp.float32),   # running max
                pltpu.VMEM((tm, 1), jnp.float32),   # running sum-exp / lse
            ],
        ),
        compiler_params=pltpu.CompilerParams(
            dimension_semantics=("parallel", "arbitrary", "arbitrary"),
            vmem_limit_bytes=vmem_limit,
        ),
    )(x2, w2, b2)

    return out.reshape(*lead, V)


if __name__ == "__main__":
    # Small deterministic config consistent with the module: d_model=32, vocab=128, B=2, S=8.
    d_model, vocab_size = 32, 128
    batch, seq = 2, 8

    key = jax.random.PRNGKey(0)
    kx, kw, kb, kw2, kb2 = jax.random.split(key, 5)

    # Deterministic parameter init (mimics nn.Linear uniform(-1/sqrt(D), 1/sqrt(D))).
    bound = 1.0 / (d_model ** 0.5)
    w = jax.random.uniform(kw, (d_model, vocab_size), jnp.float32, -bound, bound)
    b = jax.random.uniform(kb, (vocab_size,), jnp.float32, -bound, bound)
    x = jax.random.normal(kx, (batch, seq, d_model), jnp.float32)

    def ref_logsoftmax(x_, w_, b_):
        logits = jnp.einsum("...d,dv->...v", x_.astype(jnp.float32), w_.astype(jnp.float32),
                            precision=jax.lax.Precision.HIGHEST) + b_.astype(jnp.float32)
        return jax.nn.log_softmax(logits, axis=-1)

    # 1) f32 inputs (default path: bf16 matmul operands, f32 accumulate/softmax, f32 output).
    out = generator_forward(x, w, b)
    jax.block_until_ready(out)
    ref = ref_logsoftmax(x.astype(jnp.bfloat16), w.astype(jnp.bfloat16), b)
    assert out.shape == (batch, seq, vocab_size) and out.dtype == x.dtype
    assert jnp.allclose(out, ref, atol=1e-2, rtol=1e-2)

    # 2) bf16 inputs + bf16 output (production config: halved weight DMA and output writeback).
    out_bf = generator_forward(x.astype(jnp.bfloat16), w.astype(jnp.bfloat16), b,
                               out_dtype=jnp.bfloat16)
    jax.block_until_ready(out_bf)
    assert out_bf.dtype == jnp.bfloat16
    assert jnp.allclose(out_bf.astype(jnp.float32), ref, atol=6e-2, rtol=6e-2)

    # 3) Ragged M and V with a multi-tile grid (n_m=3, n_v=3), f32 matmul: exercises in-kernel
    #    vocab-tail masking, ragged edge-block stores, and the (i, p*j) output map with n_v>1.
    big_v = 300
    x_r = jax.random.normal(kx, (2, 40, d_model), jnp.float32)
    w_r = jax.random.uniform(kw2, (d_model, big_v), jnp.float32, -bound, bound)
    b_r = jax.random.uniform(kb2, (big_v,), jnp.float32, -bound, bound)
    out_r = generator_forward(x_r, w_r, b_r, tm=32, tv=128, compute_dtype=None)
    jax.block_until_ready(out_r)
    ref_r = ref_logsoftmax(x_r, w_r, b_r)
    assert out_r.shape == (2, 40, big_v)
    assert jnp.allclose(out_r, ref_r, atol=1e-4, rtol=1e-4)

    # 4) Ragged small shapes (M=10, V=100) with default tiles, f32 matmul.
    x_s = jax.random.normal(kx, (2, 5, d_model), jnp.float32)
    out_s = generator_forward(x_s, w[:, :100], b[:100], compute_dtype=None)
    jax.block_until_ready(out_s)
    ref_s = ref_logsoftmax(x_s, w[:, :100], b[:100])
    assert out_s.shape == (2, 5, 100)
    assert jnp.allclose(out_s, ref_s, atol=1e-4, rtol=1e-4)

    print("KERNEL_OK")
</pallas_src>

<mosaic_0001>
module attributes {stable_mosaic.version = 11 : i64} {
  func.func @_generator_kernel(%arg0: i32, %arg1: i32, %arg2: i32, %arg3: memref<16x32xbf16, #tpu.memory_space<vmem>>, %arg4: memref<32x128xbf16, #tpu.memory_space<vmem>>, %arg5: memref<1x128xf32, #tpu.memory_space<vmem>>, %arg6: memref<16x128xf32, #tpu.memory_space<vmem>>, %arg7: memref<16x1xf32, #tpu.memory_space<vmem>>, %arg8: memref<16x1xf32, #tpu.memory_space<vmem>>) attributes {dimension_semantics = [#tpu.dimension_semantics<parallel>, #tpu.dimension_semantics<arbitrary>, #tpu.dimension_semantics<arbitrary>], iteration_bounds = array<i64: 1, 2, 1>, scalar_prefetch = 0 : i64, scratch_operands = 2 : i64, tpu.core_type = #tpu.core_type<tc>, window_params = [{transform_indices = @transform_0, window_bounds = array<i64: 16, 32>}, {transform_indices = @transform_1, window_bounds = array<i64: 32, 128>}, {pipeline_mode = #tpu.pipeline_mode<synchronous>, transform_indices = @transform_2, window_bounds = array<i64: 1, 128>}, {transform_indices = @transform_3, window_bounds = array<i64: 16, 128>}]} {
    %c0 = arith.constant 0 : index
    %c0_0 = arith.constant 0 : index
    %0 = vector.load %arg3[%c0, %c0_0] : memref<16x32xbf16, #tpu.memory_space<vmem>>, vector<16x32xbf16>
    %c0_1 = arith.constant 0 : index
    %c0_2 = arith.constant 0 : index
    %1 = vector.load %arg4[%c0_1, %c0_2] : memref<32x128xbf16, #tpu.memory_space<vmem>>, vector<32x128xbf16>
    %cst = arith.constant dense<0.000000e+00> : vector<16x128xf32>
    %2 = tpu.matmul %0, %1, %cst {dimension_numbers = #tpu.dot_dimension_numbers<[1], [0], [0], [1], [0, 0, 1, 1], [], []>} : vector<16x32xbf16>, vector<32x128xbf16>, vector<16x128xf32> -> vector<16x128xf32>
    %3 = arith.index_cast %arg2 : i32 to index
    %c0_3 = arith.constant 0 : index
    %4 = vector.load %arg5[%3, %c0_3] : memref<1x128xf32, #tpu.memory_space<vmem>>, vector<1x128xf32>
    %5 = vector.broadcast %4 : vector<1x128xf32> to vector<16x128xf32>
    %6 = arith.addf %2, %5 : vector<16x128xf32>
    %c0_i32 = arith.constant 0 : i32
    %7 = arith.cmpi eq, %arg1, %c0_i32 : i32
    %c0_i32_4 = arith.constant 0 : i32
    %8 = arith.cmpi eq, %arg2, %c0_i32_4 : i32
    %9 = arith.andi %7, %8 : i1
    %10 = arith.extui %9 : i1 to i32
    %c0_i32_5 = arith.constant 0 : i32
    %11 = arith.cmpi ne, %10, %c0_i32_5 : i32
    scf.if %11 {
      %cst_12 = arith.constant 0xFF800000 : f32
      %23 = vector.broadcast %cst_12 : f32 to vector<16x1xf32>
      %c0_13 = arith.constant 0 : index
      %c0_14 = arith.constant 0 : index
      %24 = vector.load %arg7[%c0_13, %c0_14] : memref<16x1xf32, #tpu.memory_space<vmem>>, vector<16x1xf32>
      tpu.vector_store %arg7[%c0_13, %c0_14], %23 {strides = array<i32>} : memref<16x1xf32, #tpu.memory_space<vmem>>, vector<16x1xf32>,
      %cst_15 = arith.constant 0.000000e+00 : f32
      %25 = vector.broadcast %cst_15 : f32 to vector<16x1xf32>
      %c0_16 = arith.constant 0 : index
      %c0_17 = arith.constant 0 : index
      %26 = vector.load %arg8[%c0_16, %c0_17] : memref<16x1xf32, #tpu.memory_space<vmem>>, vector<16x1xf32>
      tpu.vector_store %arg8[%c0_16, %c0_17], %25 {strides = array<i32>} : memref<16x1xf32, #tpu.memory_space<vmem>>, vector<16x1xf32>,
    } else {
    }
    %c0_i32_6 = arith.constant 0 : i32
    %12 = arith.cmpi eq, %arg1, %c0_i32_6 : i32
    %13 = arith.extui %12 : i1 to i32
    %c0_i32_7 = arith.constant 0 : i32
    %14 = arith.cmpi ne, %13, %c0_i32_7 : i32
    scf.if %14 {
      %c0_12 = arith.constant 0 : index
      %c0_13 = arith.constant 0 : index
      %23 = vector.load %arg7[%c0_12, %c0_13] : memref<16x1xf32, #tpu.memory_space<vmem>>, vector<16x1xf32>
      %cst_14 = arith.constant dense<0xFF800000> : vector<16xf32>
      %24 = vector.multi_reduction <maximumf>, %6, %cst_14 [1] : vector<16x128xf32> to vector<16xf32>
      %25 = vector.shape_cast %24 : vector<16xf32> to vector<16x1xf32>
      %26 = arith.maximumf %23, %25 : vector<16x1xf32>
      %c0_15 = arith.constant 0 : index
      %c0_16 = arith.constant 0 : index
      %27 = vector.load %arg8[%c0_15, %c0_16] : memref<16x1xf32, #tpu.memory_space<vmem>>, vector<16x1xf32>
      %28 = arith.subf %23, %26 : vector<16x1xf32>
      %29 = math.exp %28 : vector<16x1xf32>
      %30 = arith.mulf %27, %29 : vector<16x1xf32>
      %31 = vector.broadcast %26 : vector<16x1xf32> to vector<16x128xf32>
      %32 = arith.subf %6, %31 : vector<16x128xf32>
      %33 = math.exp %32 : vector<16x128xf32>
      %cst_17 = arith.constant dense<0.000000e+00> : vector<16xf32>
      %34 = vector.multi_reduction <add>, %33, %cst_17 [1] : vector<16x128xf32> to vector<16xf32>
      %35 = vector.shape_cast %34 : vector<16xf32> to vector<16x1xf32>
      %36 = arith.addf %30, %35 : vector<16x1xf32>
      %c0_18 = arith.constant 0 : index
      %c0_19 = arith.constant 0 : index
      %37 = vector.load %arg8[%c0_18, %c0_19] : memref<16x1xf32, #tpu.memory_space<vmem>>, vector<16x1xf32>
      tpu.vector_store %arg8[%c0_18, %c0_19], %36 {strides = array<i32>} : memref<16x1xf32, #tpu.memory_space<vmem>>, vector<16x1xf32>,
      %c0_20 = arith.constant 0 : index
      %c0_21 = arith.constant 0 : index
      %38 = vector.load %arg7[%c0_20, %c0_21] : memref<16x1xf32, #tpu.memory_space<vmem>>, vector<16x1xf32>
      tpu.vector_store %arg7[%c0_20, %c0_21], %26 {strides = array<i32>} : memref<16x1xf32, #tpu.memory_space<vmem>>, vector<16x1xf32>,
    } else {
    }
    %c1_i32 = arith.constant 1 : i32
    %15 = arith.cmpi eq, %arg1, %c1_i32 : i32
    %c0_i32_8 = arith.constant 0 : i32
    %16 = arith.cmpi eq, %arg2, %c0_i32_8 : i32
    %17 = arith.andi %15, %16 : i1
    %18 = arith.extui %17 : i1 to i32
    %c0_i32_9 = arith.constant 0 : i32
    %19 = arith.cmpi ne, %18, %c0_i32_9 : i32
    scf.if %19 {
      %c0_12 = arith.constant 0 : index
      %c0_13 = arith.constant 0 : index
      %23 = vector.load %arg7[%c0_12, %c0_13] : memref<16x1xf32, #tpu.memory_space<vmem>>, vector<16x1xf32>
      %c0_14 = arith.constant 0 : index
      %c0_15 = arith.constant 0 : index
      %24 = vector.load %arg8[%c0_14, %c0_15] : memref<16x1xf32, #tpu.memory_space<vmem>>, vector<16x1xf32>
      %25 = math.log %24 : vector<16x1xf32>
      %26 = arith.addf %23, %25 : vector<16x1xf32>
      %c0_16 = arith.constant 0 : index
      %c0_17 = arith.constant 0 : index
      %27 = vector.load %arg7[%c0_16, %c0_17] : memref<16x1xf32, #tpu.memory_space<vmem>>, vector<16x1xf32>
      tpu.vector_store %arg7[%c0_16, %c0_17], %26 {strides = array<i32>} : memref<16x1xf32, #tpu.memory_space<vmem>>, vector<16x1xf32>,
    } else {
    }
    %c1_i32_10 = arith.constant 1 : i32
    %20 = arith.cmpi eq, %arg1, %c1_i32_10 : i32
    %21 = arith.extui %20 : i1 to i32
    %c0_i32_11 = arith.constant 0 : i32
    %22 = arith.cmpi ne, %21, %c0_i32_11 : i32
    scf.if %22 {
      %c0_12 = arith.constant 0 : index
      %c0_13 = arith.constant 0 : index
      %23 = vector.load %arg7[%c0_12, %c0_13] : memref<16x1xf32, #tpu.memory_space<vmem>>, vector<16x1xf32>
      %24 = vector.broadcast %23 : vector<16x1xf32> to vector<16x128xf32>
      %25 = arith.subf %6, %24 : vector<16x128xf32>
      %c0_14 = arith.constant 0 : index
      %c0_15 = arith.constant 0 : index
      %26 = vector.load %arg6[%c0_14, %c0_15] : memref<16x128xf32, #tpu.memory_space<vmem>>, vector<16x128xf32>
      tpu.vector_store %arg6[%c0_14, %c0_15], %25 {strides = array<i32>} : memref<16x128xf32, #tpu.memory_space<vmem>>, vector<16x128xf32>,
    } else {
    }
    return
  }
  func.func @transform_0(%arg0: i32, %arg1: i32, %arg2: i32) -> (i32, i32) {
    %c0_i32 = arith.constant 0 : i32
    %c0_i32_0 = arith.constant 0 : i32
    return %arg0, %c0_i32 : i32, i32
  }
  func.func @transform_1(%arg0: i32, %arg1: i32, %arg2: i32) -> (i32, i32) {
    %c0_i32 = arith.constant 0 : i32
    %c0_i32_0 = arith.constant 0 : i32
    return %c0_i32, %arg2 : i32, i32
  }
  func.func @transform_2(%arg0: i32, %arg1: i32, %arg2: i32) -> (i32, i32) {
    %c0_i32 = arith.constant 0 : i32
    %c0_i32_0 = arith.constant 0 : i32
    %c0_i32_1 = arith.constant 0 : i32
    return %c0_i32, %c0_i32_0 : i32, i32
  }
  func.func @transform_3(%arg0: i32, %arg1: i32, %arg2: i32) -> (i32, i32) {
    %0 = arith.muli %arg1, %arg2 : i32
    %c0_i32 = arith.constant 0 : i32
    return %arg0, %0 : i32, i32
  }
}

</mosaic_0001>

<bundles_post_ra>
// kernel: tpu_custom_call.1
= control target key start
LH: loop header
LB: loop body
LE: loop exit
PB: predicated region body
PF: predicated region fallthrough
CT: control target
= control target key end

     0   :  { %8 = vsyncpa [#allocation5], 0  ;;  %s835_s0 = inlined_call_operand.hbm [shape: bf16[16,32], index: 0, kind: input, shape index: {}]   ;;  %s836_s1 = inlined_call_operand.hbm [shape: bf16[32,128], index: 1, kind: input, shape index: {}]   ;;  %s837_s2 = inlined_call_operand.vmem [shape: f32[1,128], index: 2, kind: input, shape index: {}]   ;;  %s838_s3 = inlined_call_operand.hbm [shape: f32[16,128], index: 3, kind: output, shape index: {}]  }
   0x1   :  { %9 = vsyncpa [#allocation8], 0 }
   0x2   :  { %10 = vsyncpa [#allocation6], 0 }
   0x3   :  { %12 = vsyncpa [#allocation6 + $0x1], 0  ;;  %s745_s12 = smov 0   ;;  %s747_s13 = smov 0  }
   0x4   :  { %s749_s14 = smov 0  }
   0x5 LB: > { %s475_s15 = sadd.s32 4294967295, %s712_s14   ;;  %s476_s16 = sadd.s32 4294967294, %s712_s14   ;;  %s712_s14 = sphi %s749_s14, %s18_s14   ;;  %s708_s13 = sphi %s747_s13, %s842_s13   ;;  %s704_s12 = sphi %s745_s12, %s841_s12  }
   0x6   : > { %s33_s17 = sadd.s32 1, %s708_s13  ;;  %p477_p0 = scmp.ge.s32.totalorder %s712_s14, 1 }
   0x7   : > { %p35_p1 = scmp.ge.s32.totalorder %s33_s17, 2  ;;  %p145_p2 = scmp.lt.s32.totalorder %s712_s14, 3 }
   0x8   : > { %p767_p3 = scmp.eq.s32.totalorder %s475_s15, 0  ;;  %s159_s22 = sshll.u32 %s835_s0, 4  ;;  %s160_s22 = int_to_ptr.hbm [resolvable:$true] %s159_s22 }
   0x9   : > { %s844_s17 = smov (%p35_p1, %s33_s17), 0  ;;  %p773_p4 = pnand %p477_p0, %p145_p2 }
   0xa   : > { %s714_s23 = smov [#allocation4]   ;;  %s175_s27 = sshll.u32 %s836_s1, 4  ;;  %s176_s27 = int_to_ptr.hbm [resolvable:$true] %s175_s27 }
   0xb   : > { %p521_p5 = pneg %p773_p4  ;;  %s161_s24 = sshll.u32 %s714_s23, 4  ;;  %s162_s24 = int_to_ptr.vmem [resolvable:$true] %s161_s24 }
   0xc   : > { %s715_s28 = smov 64   ;;  %s716_s29 = smov 4  }
   0xd   : > { %p522_p6 = pnand %p767_p3, %p521_p5  ;;  %s717_s30 = smov [#allocation7]  }
   0xe   : > { %s177_s4 = sshll.u32 %s717_s30, 4  ;;  %196 = sbr.rel (%p773_p4) target bundleno = 701 (0x2bd), region = 32  ;;  %s178_s4 = int_to_ptr.vmem [resolvable:$true] %s177_s4 }
   0xf   : > { %524 = dma.hbm_to_vmem [thread:$0]  (!%p522_p6), %s160_s22, 128, %s162_s24, [#allocation5], %s715_s28, %s715_s28, %s716_s29  }
  0x10   : > { %527 = dma.hbm_to_vmem [thread:$0]  (!%p522_p6), %s176_s27, 256, %s178_s4, [#allocation8], %s715_s28, %s715_s28, %s716_s29  }
  0x13   : > { %691 = dma.done.wait (%p767_p3), [#allocation5], 128  }
  0x14   : > { %693 = vsyncadd (%p767_p3), [#allocation5], 4294967168 }
  0x15   : > { %695 = dma.done.wait (%p767_p3), [#allocation8], 256  }
  0x16   : > { %697 = vsyncadd (%p767_p3), [#allocation8], 4294967040  ;;  %v506_v0 = vld [vmem:[#allocation7 + $0x8] sm:$0xff]  ;;  %v505_v1 = vld [vmem:[#allocation7] sm:$0xff]  ;;  %vm253_vm0 = vcmask 261120   ;;  %p271_p7 = scmp.eq.s32.totalorder %s704_s12, 0 }
  0x17   : > { %263 = vmatpush.bf16.msra.mxu0 %v506_v0  ;;  %v504_v2 = vld [vmem:[#allocation4] sm:$0xff]  ;;  %vm277_vm1 = vcmask (%p271_p7), 7168   ;;  %v718_v8 = vmov (%p271_p7), -inf   ;;  %v719_v9 = vmov (%p271_p7), 0.0  }
  0x18   : > { %v574_v3 = vld [vmem:[%s837_s2] ss:$0 sm:$0xff]  ;;  %278 = vst.msk [vmem:[#allocation2] sm:$0xff] (%p271_p7), %vm277_vm1, %v718_v8 }
  0x19   : > { %279 = vst.msk [vmem:[#allocation2 + $0x8] sm:$0xff] (%p271_p7), %vm277_vm1, %v718_v8 }
  0x1a   : > { %280 = vst.msk [vmem:[#allocation3] sm:$0xff] (%p271_p7), %vm277_vm1, %v719_v9 }
  0x1b   : > { %264 = vmatpush.bf16.msra.mxu0 %v505_v1  ;;  %281 = vst.msk [vmem:[#allocation3 + $0x8] sm:$0xff] (%p271_p7), %vm277_vm1, %v719_v9 }
  0x1e   : > { %495 = vmatmul.msk.bf16.vlgmr.msra.gmra.mxu0 %vm253_vm0, %v504_v2 }
  0x9b   : > { %v266_v4 = vpop.f32.mrf.mxu0 }
  0x9c   : > { %v801_v5 = vadd.f32 %v574_v3, %v266_v4 }
  0xa0   : > { %276 = sbr.rel (!%p271_p7) target bundleno = 165 (0xa5), region = 44 }
  0xa3   : > { %v268_v6 = vpop.f32.mrf.mxu0 }
  0xa4   : > { %v803_v7 = vadd.f32 %v574_v3, %v268_v6 }
  0xa5 PF: > { %p497_p8 = scmp.ne.s32.totalorder %s704_s12, 0 }
  0xa7   : > { %284 = sbr.rel (%p497_p8) target bundleno = 543 (0x21f), region = 48 }
  0xac   : > { %287 = vmax.xlane.f32.xlu0 %v801_v5  ;;  %v720_v10 = vmov 0   ;;  %v285_v11 = vld [vmem:[#allocation2] sm:$0xff]  ;;  %vm325_vm2 = vcmask 7168   ;;  %v286_v15 = vld [vmem:[#allocation2 + $0x8] sm:$0xff]  ;;  %v293_v30 = vld [vmem:[#allocation3] sm:$0xff] }
  0xad   : > { %575 = vset.pattern.permute.xlu1 %v720_v10  ;;  %576 = vset.pattern.permute.xlu0 %v720_v10  ;;  %v294_v35 = vld [vmem:[#allocation3 + $0x8] sm:$0xff] }
  0xb4   : > { %289 = vmax.xlane.f32.xlu0 %v803_v7 }
 0x11f   : > { %v288_v12 = vpop.xlane.xlu0 %287 }
 0x120   : > { %v291_v13 = vmax.f32 %v285_v11, %v288_v12 }
 0x122   : > { %v295_v14 = vsub.f32 %v285_v11, %v291_v13  ;;  %328 = vst.msk [vmem:[#allocation2] sm:$0xff] %vm325_vm2, %v291_v13  ;;  %305 = vperm.xlu1 %575, %v291_v13  }
 0x124   : > { %v297_v27 = vmul.f32 1.442695, %v295_v14 }
 0x127   : > { %v290_v16 = vpop.xlane.xlu0 %289 }
 0x128   : > { %v292_v17 = vmax.f32 %v286_v15, %v290_v16 }
 0x12a   : > { %v296_v18 = vsub.f32 %v286_v15, %v292_v17  ;;  %329 = vst.msk [vmem:[#allocation2 + $0x8] sm:$0xff] %vm325_vm2, %v292_v17  ;;  %310 = vperm.xlu1 %575, %v292_v17  }
 0x12c   : > { %v299_v28 = vmul.f32 1.442695, %v296_v18 }
 0x194   : > { %v306_v19 = vpop.permute.xlu1 %305 }
 0x195   : > { %v313_v20 = vsub.f32 %v801_v5, %v306_v19 }
 0x197   : > { %v315_v21 = vmul.f32 1.442695, %v313_v20 }
 0x199   : > { %577 = vpow2.f32 %v315_v21 }
 0x19c   : > { %v311_v22 = vpop.permute.xlu1 %310 }
 0x19d   : > { %v314_v23 = vsub.f32 %v803_v7, %v311_v22 }
 0x19f   : > { %v578_v24 = vpop.eup %577  ;;  %v317_v25 = vmul.f32 1.442695, %v314_v23 }
 0x1a0   : > { %319 = vadd.xlane.f32.xlu2 %v578_v24 }
 0x1a1   : > { %579 = vpow2.f32 %v317_v25 }
 0x1a2   : > { %581 = vpow2.f32 %v297_v27 }
 0x1a3   : > { %583 = vpow2.f32 %v299_v28 }
 0x1a7   : > { %v580_v26 = vpop.eup %579 }
 0x1a8   : > { %321 = vadd.xlane.f32.xlu2 %v580_v26  ;;  %v582_v29 = vpop.eup %581 }
 0x1a9   : > { %v301_v31 = vmul.f32 %v582_v29, %v293_v30  ;;  %v584_v34 = vpop.eup %583 }
 0x1aa   : > { %v302_v36 = vmul.f32 %v584_v34, %v294_v35 }
 0x213   : > { %v320_v32 = vpop.xlane.xlu2 %319 }
 0x214   : > { %v323_v33 = vadd.f32 %v320_v32, %v301_v31 }
 0x216   : > { %326 = vst.msk [vmem:[#allocation3] sm:$0xff] %vm325_vm2, %v323_v33 }
 0x21b   : > { %v322_v37 = vpop.xlane.xlu2 %321 }
 0x21c   : > { %v324_v38 = vadd.f32 %v322_v37, %v302_v36 }
 0x21e   : > { %327 = vst.msk [vmem:[#allocation3 + $0x8] sm:$0xff] %vm325_vm2, %v324_v38 }
 0x21f PF: > { %p330_p9 = scmp.eq.s32.totalorder %s704_s12, 1 }
 0x220   : > { %v337_v39 = vld [vmem:[#allocation3] sm:$0xff] (%p330_p9)  ;;  %v335_v42 = vld [vmem:[#allocation2] sm:$0xff] (%p330_p9)  ;;  %v336_v45 = vld [vmem:[#allocation2 + $0x8] sm:$0xff] (%p330_p9)  ;;  %vm345_vm3 = vcmask (%p330_p9), 7168  }
 0x221   : > { %334 = sbr.rel (!%p330_p9) target bundleno = 562 (0x232), region = 52  ;;  %585 = vlog2.f32 (%p330_p9), %v337_v39 }
 0x225   : > { %v338_v40 = vld [vmem:[#allocation3 + $0x8] sm:$0xff] (%p330_p9) }
 0x226   : > { %587 = vlog2.f32 %v338_v40 }
 0x227   : > { %v586_v41 = vpop.eup %585 }
 0x228   : > { %v340_v44 = vmul.f32 0.6931472, %v586_v41 }
 0x22a   : > { %v343_v47 = vadd.f32 %v340_v44, %v335_v42 }
 0x22c   : > { %v588_v43 = vpop.eup %587  ;;  %346 = vst.msk [vmem:[#allocation2] sm:$0xff] %vm345_vm3, %v343_v47 }
 0x22d   : > { %v342_v46 = vmul.f32 0.6931472, %v588_v43 }
 0x22f   : > { %v344_v48 = vadd.f32 %v342_v46, %v336_v45 }
 0x231   : > { %347 = vst.msk [vmem:[#allocation2 + $0x8] sm:$0xff] %vm345_vm3, %v344_v48 }
 0x232 PF: > { %p499_p10 = scmp.ne.s32.totalorder %s704_s12, 1 }
 0x234   : > { %350 = sbr.rel (%p499_p10) target bundleno = 697 (0x2b9), region = 56 }
 0x239   : > { %v351_v49 = vld [vmem:[#allocation2] sm:$0xff]  ;;  %v721_v50 = vmov 0   ;;  %v352_v51 = vld [vmem:[#allocation2 + $0x8] sm:$0xff] }
 0x23a   : > { %589 = vset.pattern.permute.xlu0 %v721_v50 }
 0x23b   : > { %355 = vperm.xlu0 %589, %v351_v49  }
 0x243   : > { %360 = vperm.xlu0 %589, %v352_v51  }
 0x2ad   : > { %v356_v52 = vpop.permute.xlu0 %355 }
 0x2ae   : > { %v363_v53 = vsub.f32 %v801_v5, %v356_v52 }
 0x2b0   : > { %365 = vst [vmem:[#allocation9] sm:$0xff] %v363_v53 }
 0x2b5   : > { %v361_v54 = vpop.permute.xlu0 %360 }
 0x2b6   : > { %v364_v55 = vsub.f32 %v803_v7, %v361_v54 }
 0x2b8   : > { %366 = vst [vmem:[#allocation9 + $0x8] sm:$0xff] %v364_v55 }
 0x2b9 PF: > { %p536_p11 = scmp.eq.s32.totalorder %s475_s15, 1  ;;  %s384_s9 = sshll.u32 %s838_s3, 4  ;;  %s385_s9 = int_to_ptr.hbm [resolvable:$true] %s384_s9 }
 0x2ba   : > { %s722_s10 = smov [#allocation9]   ;;  %s723_s12 = smov 128  }
 0x2bb   : > { %s382_s11 = sshll.u32 %s722_s10, 4  ;;  %s724_s18 = smov 8   ;;  %s383_s11 = int_to_ptr.vmem [resolvable:$true] %s382_s11 }
 0x2bc   : > { %518 = dma.vmem_to_hbm [thread:$0]  (%p536_p11), %s383_s11, 256, %s385_s9, [#allocation6], %s723_s12, %s723_s12, %s724_s18  }
 0x2bd PF: > { %p537_p12 = scmp.ge.s32.totalorder %s712_s14, 2  ;;  %p538_p13 = scmp.eq.s32.totalorder %s476_s16, 1 }
 0x2bf   : > { %p529_p0 = pnand %p538_p13, %p537_p12 }
 0x2c1   : > { %p530_p1 = pneg %p529_p0 }
 0x2c3   : > { %699 = dma.done.wait (%p530_p1), [#allocation6], 256  }
 0x2c4   : > { %701 = vsyncadd (%p530_p1), [#allocation6], 4294967040  ;;  %s18_s14 = sadd.s32 1, %s712_s14   ;;  %s841_s12 = smov %s708_s13 }
 0x2c5   : > { %p15_p2 = scmp.ge.s32.totalorder %s18_s14, 4   ;;  %s842_s13 = smov %s844_s17 }
 0x2c7   :  { %17 = sbr.rel (!%p15_p2) target bundleno = 5 (0x5), region = 92 }
 0x2cc   :  { %406 = vsyncpa [#allocation5], 1 }
 0x2cd   :  { %408 = vsyncpa [#allocation5 + $0x1], 1 }
 0x2ce   :  { %409 = vsyncpa [#allocation8], 1 }
 0x2cf   :  { %410 = vsyncpa [#allocation6], 1 }
 0x2d0   :  { %412 = vsyncpa [#allocation6 + $0x1], 1 }

</bundles_post_ra>
